<compile_context>
chip_gen: v6e
topology: v6e:2x2x1
jax: 0.10.0
libtpu: 0.0.40
codegen_flags: <defaults>
</compile_context>

<pallas_src>
import functools

import jax
import jax.numpy as jnp
from jax.experimental import pallas as pl
from jax.experimental.pallas import tpu as pltpu


def _round_up(x, m):
    return ((x + m - 1) // m) * m


def _postprocess_kernel(img_w, img_h, num_classes,
                        logits_ref, boxes_ref,
                        boxes_out_ref, scores_ref, labels_ref):
    # ---------------- scores / labels ----------------
    # logits_ref: (tile_n, Cp) in the natural layout.  One in-kernel transpose
    # (XLU slot, hidden under the DMA) puts queries on the lane axis so the
    # reductions run on fully packed vregs and the stores are lane-dense.
    logits = logits_ref[...].astype(jnp.float32)            # (tile_n, Cp)
    lgT = logits.T                                           # (Cp, tile_n)
    cp = lgT.shape[0]
    max_logit = jnp.max(lgT, axis=0, keepdims=True)          # (1, tile_n)
    class_idx = jax.lax.broadcasted_iota(jnp.int32, lgT.shape, 0)
    # First class index attaining the max (== on the max value is exact).
    cand = jnp.where(lgT == max_logit, class_idx, jnp.int32(cp))
    label = jnp.min(cand, axis=0, keepdims=True)
    labels_ref[...] = jnp.minimum(label, num_classes - 1)    # clamp (NaN rows)
    # sigmoid is monotonic -> only tile_n transcendentals (EUP), not tile_n*C.
    scores_ref[...] = jax.nn.sigmoid(max_logit)              # (1, tile_n) f32

    # ---------------- boxes ----------------
    # boxes_ref is the flat row-major [N,4] cxcywh buffer viewed as (rows,128):
    # lane j of a row holds query (32*row + j//4), coordinate j%4.
    # cxcywh -> xyxy only needs the +/-2-lane neighbour (cx<->w, cy<->h):
    # two XLU lane-rotates + pure VPU selects.  The output keeps the same
    # interleaved layout => bit-identical to row-major [N,4] xyxy, and the
    # stores are full-lane (unmasked) vector stores.
    b = boxes_ref[...].astype(jnp.float32)                    # (rows, 128)
    lane = jax.lax.broadcasted_iota(jnp.int32, b.shape, 1)
    coord = lane % 4                                          # 0:cx 1:cy 2:w 3:h
    is_lo = coord < 2
    nbr_hi = pltpu.roll(b, 126, 1)    # nbr_hi[j] = b[j+2]  (w/h seen from cx/cy)
    nbr_lo = pltpu.roll(b, 2, 1)      # nbr_lo[j] = b[j-2]  (cx/cy seen from w/h)
    center = jnp.where(is_lo, b, nbr_lo)
    size = jnp.where(is_lo, nbr_hi, b)
    half = jnp.where(is_lo, jnp.float32(-0.5), jnp.float32(0.5))
    scale = jnp.where(lane % 2 == 0, jnp.float32(img_w), jnp.float32(img_h))
    boxes_out_ref[...] = (center + half * size) * scale


def tracker_post_process(pred_logits, pred_boxes, target_size, *,
                         max_tile_n=8192):
    """Pallas TPU forward of TrackerPostProcess.

    pred_logits: [N, C] float (f32 or bf16), pred_boxes: [N, 4] cxcywh,
    target_size: (img_h, img_w) python scalars.
    Returns (boxes_xyxy [N,4] f32, scores [N] f32, labels [N] i32).
    """
    N, C = pred_logits.shape
    assert pred_boxes.shape == (N, 4)
    img_h, img_w = float(target_size[0]), float(target_size[1])

    if N == 0:
        return (jnp.zeros((0, 4), jnp.float32),
                jnp.zeros((0,), jnp.float32),
                jnp.zeros((0,), jnp.int32))

    # Keep the in-kernel transpose on (8-aligned) class dims; -inf pad never
    # wins the max.  No-op for typical class counts (e.g. C=16).
    if C % 8 != 0:
        cp = _round_up(C, 8)
        pred_logits = jnp.pad(pred_logits, ((0, 0), (0, cp - C)),
                              constant_values=-jnp.inf)
    else:
        cp = C

    max_tile_n = max(256, _round_up(max_tile_n, 256))
    if N < 512:
        # Tiny problem: single grid step, blocks == full (padded) arrays.
        tile_n = _round_up(N, 128)
        grid = 1
    else:
        # >= 2 grid steps so both v7x TensorCores get work ("parallel" axis);
        # tile_n multiple of 256 keeps every block (8, 128)-aligned.
        tile_n = min(max_tile_n, _round_up(pl.cdiv(N, 2), 256))
        grid = pl.cdiv(N, tile_n)
    n_pad = grid * tile_n

    # Logits: natural [N, C] layout.  Only padded in the tiny single-step case
    # (a few KB); for the multi-step path the ragged last block is handled by
    # Pallas -- no extra HBM pass over the dominant stream.
    logits_in = pred_logits
    if grid == 1 and n_pad != N:
        logits_in = jnp.pad(logits_in, ((0, n_pad - N), (0, 0)))

    # Boxes: free row-major reshape into lane-dense (rows, 128) tiles
    # (32 queries per row).  Padding queries up to n_pad is 16 B/query.
    boxes_flat = pred_boxes.reshape(-1)
    if n_pad != N:
        boxes_flat = jnp.pad(boxes_flat, (0, 4 * (n_pad - N)))
    boxes_in = boxes_flat.reshape(n_pad // 32, 128)
    box_rows = tile_n // 32

    kernel = functools.partial(_postprocess_kernel, img_w, img_h, C)

    bytes_accessed = int(N * (cp * pred_logits.dtype.itemsize
                              + 4 * pred_boxes.dtype.itemsize
                              + 16 + 4 + 4))
    cost = pl.CostEstimate(flops=2 * N * cp + 10 * N,
                           transcendentals=N,
                           bytes_accessed=bytes_accessed)

    boxes_out, scores_out, labels_out = pl.pallas_call(
        kernel,
        out_shape=(
            jax.ShapeDtypeStruct((n_pad // 32, 128), jnp.float32),  # xyxy (interleaved row-major)
            jax.ShapeDtypeStruct((1, n_pad), jnp.float32),          # scores
            jax.ShapeDtypeStruct((1, n_pad), jnp.int32),            # labels
        ),
        grid_spec=pltpu.PrefetchScalarGridSpec(
            num_scalar_prefetch=0,
            grid=(grid,),
            in_specs=[
                pl.BlockSpec((tile_n, cp), lambda i: (i, 0)),       # logits tile
                pl.BlockSpec((box_rows, 128), lambda i: (i, 0)),    # boxes tile
            ],
            out_specs=[
                pl.BlockSpec((box_rows, 128), lambda i: (i, 0)),    # xyxy boxes
                pl.BlockSpec((1, tile_n), lambda i: (0, i)),        # scores
                pl.BlockSpec((1, tile_n), lambda i: (0, i)),        # labels
            ],
        ),
        compiler_params=pltpu.CompilerParams(
            dimension_semantics=("parallel",),
            vmem_limit_bytes=32 * 1024 * 1024),
        cost_estimate=cost,
    )(logits_in, boxes_in)

    # Free reshapes / tiny slices only -- no XLA transpose passes.
    boxes = boxes_out.reshape(-1)[: 4 * N].reshape(N, 4)
    scores = scores_out[0, :N]
    labels = labels_out[0, :N]
    return boxes, scores, labels


def _reference(pred_logits, pred_boxes, target_size):
    prob = jax.nn.sigmoid(pred_logits)
    scores = prob.max(-1)
    labels = jnp.argmax(pred_logits, axis=-1).astype(jnp.int32)
    cx, cy, w, h = [pred_boxes[:, i] for i in range(4)]
    boxes = jnp.stack([cx - 0.5 * w, cy - 0.5 * h,
                       cx + 0.5 * w, cy + 0.5 * h], -1)
    img_h, img_w = target_size
    scale = jnp.array([img_w, img_h, img_w, img_h], dtype=jnp.float32)
    return boxes * scale[None, :], scores, labels


if __name__ == "__main__":
    key = jax.random.PRNGKey(0)
    k1, k2 = jax.random.split(key)
    N, C = 128, 16                      # small: 128 track queries, 16 classes
    pred_logits = jax.random.normal(k1, (N, C), dtype=jnp.float32)
    pred_boxes = jax.random.uniform(k2, (N, 4), dtype=jnp.float32,
                                    minval=0.05, maxval=0.95)   # cxcywh in [0,1]
    target_size = (600.0, 800.0)        # (img_h, img_w)

    boxes, scores, labels = tracker_post_process(pred_logits, pred_boxes, target_size)
    jax.block_until_ready((boxes, scores, labels))

    ref_boxes, ref_scores, ref_labels = _reference(pred_logits, pred_boxes, target_size)
    assert jnp.allclose(boxes, ref_boxes, atol=1e-4, rtol=1e-4)
    assert jnp.allclose(scores, ref_scores, atol=1e-5, rtol=1e-5)
    assert jnp.array_equal(labels, ref_labels)

    # Ragged small-N path (padded internally to 128, single block).
    Nr = 77
    br, sr, lr = tracker_post_process(pred_logits[:Nr], pred_boxes[:Nr], target_size)
    jax.block_until_ready((br, sr, lr))
    assert jnp.allclose(br, ref_boxes[:Nr], atol=1e-4, rtol=1e-4)
    assert jnp.allclose(sr, ref_scores[:Nr], atol=1e-5, rtol=1e-5)
    assert jnp.array_equal(lr, ref_labels[:Nr])

    # Multi-step parallel grid path (2 steps, ragged logits last block).
    Nm = 640
    k3, k4 = jax.random.split(k2)
    lg_m = jax.random.normal(k3, (Nm, C), dtype=jnp.float32)
    bx_m = jax.random.uniform(k4, (Nm, 4), dtype=jnp.float32,
                              minval=0.05, maxval=0.95)
    bm, sm, lm = tracker_post_process(lg_m, bx_m, target_size)
    jax.block_until_ready((bm, sm, lm))
    rbm, rsm, rlm = _reference(lg_m, bx_m, target_size)
    assert jnp.allclose(bm, rbm, atol=1e-4, rtol=1e-4)
    assert jnp.allclose(sm, rsm, atol=1e-5, rtol=1e-5)
    assert jnp.array_equal(lm, rlm)

    print("KERNEL_OK")
</pallas_src>

<mosaic_0001>
module attributes {stable_mosaic.version = 11 : i64} {
  func.func @_postprocess_kernel(%arg0: i32, %arg1: memref<128x16xf32, #tpu.memory_space<vmem>>, %arg2: memref<4x128xf32, #tpu.memory_space<vmem>>, %arg3: memref<4x128xf32, #tpu.memory_space<vmem>>, %arg4: memref<1x128xf32, #tpu.memory_space<vmem>>, %arg5: memref<1x128xi32, #tpu.memory_space<vmem>>) attributes {dimension_semantics = [#tpu.dimension_semantics<parallel>], iteration_bounds = array<i64: 1>, scalar_prefetch = 0 : i64, scratch_operands = 0 : i64, tpu.core_type = #tpu.core_type<tc>, window_params = [{transform_indices = @transform_0, window_bounds = array<i64: 128, 16>}, {transform_indices = @transform_1, window_bounds = array<i64: 4, 128>}, {transform_indices = @transform_2, window_bounds = array<i64: 4, 128>}, {transform_indices = @transform_3, window_bounds = array<i64: 1, 128>}, {transform_indices = @transform_4, window_bounds = array<i64: 1, 128>}]} {
    %c0 = arith.constant 0 : index
    %c0_0 = arith.constant 0 : index
    %0 = vector.load %arg1[%c0, %c0_0] : memref<128x16xf32, #tpu.memory_space<vmem>>, vector<128x16xf32>
    %1 = tpu.transpose %0, [1, 0] : vector<128x16xf32> -> vector<16x128xf32>
    %cst = arith.constant dense<0xFF800000> : vector<128xf32>
    %2 = vector.multi_reduction <maximumf>, %1, %cst [0] : vector<16x128xf32> to vector<128xf32>
    %3 = vector.shape_cast %2 : vector<128xf32> to vector<1x128xf32>
    %4 = tpu.iota {dimensions = array<i32: 0>} : vector<16x128xi32>
    %5 = vector.broadcast %3 : vector<1x128xf32> to vector<16x128xf32>
    %6 = arith.cmpf oeq, %1, %5 : vector<16x128xf32>
    %c16_i32 = arith.constant 16 : i32
    %7 = vector.broadcast %c16_i32 : i32 to vector<16x128xi32>
    %8 = arith.select %6, %4, %7 : vector<16x128xi1>, vector<16x128xi32>
    %cst_1 = arith.constant dense<2147483647> : vector<128xi32>
    %9 = vector.multi_reduction <minsi>, %8, %cst_1 [0] : vector<16x128xi32> to vector<128xi32>
    %10 = vector.shape_cast %9 : vector<128xi32> to vector<1x128xi32>
    %c15_i32 = arith.constant 15 : i32
    %11 = vector.broadcast %c15_i32 : i32 to vector<1x128xi32>
    %12 = arith.minsi %10, %11 : vector<1x128xi32>
    %c0_2 = arith.constant 0 : index
    %c0_3 = arith.constant 0 : index
    %13 = vector.load %arg5[%c0_2, %c0_3] : memref<1x128xi32, #tpu.memory_space<vmem>>, vector<1x128xi32>
    tpu.vector_store %arg5[%c0_2, %c0_3], %12 {strides = array<i32>} : memref<1x128xi32, #tpu.memory_space<vmem>>, vector<1x128xi32>,
    %14 = arith.negf %3 : vector<1x128xf32>
    %15 = math.exp %14 : vector<1x128xf32>
    %cst_4 = arith.constant 1.000000e+00 : f32
    %16 = vector.broadcast %cst_4 : f32 to vector<1x128xf32>
    %17 = arith.addf %16, %15 : vector<1x128xf32>
    %18 = arith.divf %16, %17 : vector<1x128xf32>
    %c0_5 = arith.constant 0 : index
    %c0_6 = arith.constant 0 : index
    %19 = vector.load %arg4[%c0_5, %c0_6] : memref<1x128xf32, #tpu.memory_space<vmem>>, vector<1x128xf32>
    tpu.vector_store %arg4[%c0_5, %c0_6], %18 {strides = array<i32>} : memref<1x128xf32, #tpu.memory_space<vmem>>, vector<1x128xf32>,
    %c0_7 = arith.constant 0 : index
    %c0_8 = arith.constant 0 : index
    %20 = vector.load %arg2[%c0_7, %c0_8] : memref<4x128xf32, #tpu.memory_space<vmem>>, vector<4x128xf32>
    %21 = tpu.iota {dimensions = array<i32: 1>} : vector<4x128xi32>
    %c4_i32 = arith.constant 4 : i32
    %c0_i32 = arith.constant 0 : i32
    %22 = arith.cmpi eq, %c4_i32, %c0_i32 : i32
    %c1_i32 = arith.constant 1 : i32
    %23 = arith.select %22, %c1_i32, %c4_i32 : i32
    %24 = vector.broadcast %23 : i32 to vector<4x128xi32>
    %25 = arith.remsi %21, %24 : vector<4x128xi32>
    %c0_i32_9 = arith.constant 0 : i32
    %26 = vector.broadcast %c0_i32_9 : i32 to vector<4x128xi32>
    %27 = arith.cmpi ne, %25, %26 : vector<4x128xi32>
    %c0_i32_10 = arith.constant 0 : i32
    %28 = vector.broadcast %c0_i32_10 : i32 to vector<4x128xi32>
    %29 = arith.cmpi slt, %25, %28 : vector<4x128xi32>
    %c0_i32_11 = arith.constant 0 : i32
    %30 = arith.cmpi slt, %23, %c0_i32_11 : i32
    %31 = vector.broadcast %30 : i1 to vector<4x128xi1>
    %32 = vector.broadcast %31 : vector<4x128xi1> to vector<4x128xi1>
    %33 = arith.xori %29, %32 : vector<4x128xi1>
    %34 = arith.andi %33, %27 : vector<4x128xi1>
    %35 = vector.broadcast %23 : i32 to vector<4x128xi32>
    %36 = arith.addi %25, %35 : vector<4x128xi32>
    %37 = arith.select %34, %36, %25 : vector<4x128xi1>, vector<4x128xi32>
    %c2_i32 = arith.constant 2 : i32
    %38 = vector.broadcast %c2_i32 : i32 to vector<4x128xi32>
    %39 = arith.cmpi slt, %37, %38 : vector<4x128xi32>
    %c126_i32 = arith.constant 126 : i32
    %40 = tpu.dynamic_rotate %20 by %c126_i32 dim 1 : vector<4x128xf32>, i32 -> vector<4x128xf32>
    %c2_i32_12 = arith.constant 2 : i32
    %41 = tpu.dynamic_rotate %20 by %c2_i32_12 dim 1 : vector<4x128xf32>, i32 -> vector<4x128xf32>
    %42 = arith.select %39, %20, %41 : vector<4x128xi1>, vector<4x128xf32>
    %43 = arith.select %39, %40, %20 : vector<4x128xi1>, vector<4x128xf32>
    %cst_13 = arith.constant -5.000000e-01 : f32
    %cst_14 = arith.constant 5.000000e-01 : f32
    %44 = vector.broadcast %cst_13 : f32 to vector<4x128xf32>
    %45 = vector.broadcast %cst_14 : f32 to vector<4x128xf32>
    %46 = arith.select %39, %44, %45 : vector<4x128xi1>, vector<4x128xf32>
    %c2_i32_15 = arith.constant 2 : i32
    %c0_i32_16 = arith.constant 0 : i32
    %47 = arith.cmpi eq, %c2_i32_15, %c0_i32_16 : i32
    %c1_i32_17 = arith.constant 1 : i32
    %48 = arith.select %47, %c1_i32_17, %c2_i32_15 : i32
    %49 = vector.broadcast %48 : i32 to vector<4x128xi32>
    %50 = arith.remsi %21, %49 : vector<4x128xi32>
    %c0_i32_18 = arith.constant 0 : i32
    %51 = vector.broadcast %c0_i32_18 : i32 to vector<4x128xi32>
    %52 = arith.cmpi ne, %50, %51 : vector<4x128xi32>
    %c0_i32_19 = arith.constant 0 : i32
    %53 = vector.broadcast %c0_i32_19 : i32 to vector<4x128xi32>
    %54 = arith.cmpi slt, %50, %53 : vector<4x128xi32>
    %c0_i32_20 = arith.constant 0 : i32
    %55 = arith.cmpi slt, %48, %c0_i32_20 : i32
    %56 = vector.broadcast %55 : i1 to vector<4x128xi1>
    %57 = vector.broadcast %56 : vector<4x128xi1> to vector<4x128xi1>
    %58 = arith.xori %54, %57 : vector<4x128xi1>
    %59 = arith.andi %58, %52 : vector<4x128xi1>
    %60 = vector.broadcast %48 : i32 to vector<4x128xi32>
    %61 = arith.addi %50, %60 : vector<4x128xi32>
    %62 = arith.select %59, %61, %50 : vector<4x128xi1>, vector<4x128xi32>
    %c0_i32_21 = arith.constant 0 : i32
    %63 = vector.broadcast %c0_i32_21 : i32 to vector<4x128xi32>
    %64 = arith.cmpi eq, %62, %63 : vector<4x128xi32>
    %cst_22 = arith.constant 8.000000e+02 : f32
    %cst_23 = arith.constant 6.000000e+02 : f32
    %65 = vector.broadcast %cst_22 : f32 to vector<4x128xf32>
    %66 = vector.broadcast %cst_23 : f32 to vector<4x128xf32>
    %67 = arith.select %64, %65, %66 : vector<4x128xi1>, vector<4x128xf32>
    %68 = arith.mulf %46, %43 : vector<4x128xf32>
    %69 = arith.addf %42, %68 : vector<4x128xf32>
    %70 = arith.mulf %69, %67 : vector<4x128xf32>
    %c0_24 = arith.constant 0 : index
    %c0_25 = arith.constant 0 : index
    %71 = vector.load %arg3[%c0_24, %c0_25] : memref<4x128xf32, #tpu.memory_space<vmem>>, vector<4x128xf32>
    tpu.vector_store %arg3[%c0_24, %c0_25], %70 {strides = array<i32>} : memref<4x128xf32, #tpu.memory_space<vmem>>, vector<4x128xf32>,
    return
  }
  func.func @transform_0(%arg0: i32) -> (i32, i32) {
    %c0_i32 = arith.constant 0 : i32
    %c0_i32_0 = arith.constant 0 : i32
    return %arg0, %c0_i32 : i32, i32
  }
  func.func @transform_1(%arg0: i32) -> (i32, i32) {
    %c0_i32 = arith.constant 0 : i32
    %c0_i32_0 = arith.constant 0 : i32
    return %arg0, %c0_i32 : i32, i32
  }
  func.func @transform_2(%arg0: i32) -> (i32, i32) {
    %c0_i32 = arith.constant 0 : i32
    %c0_i32_0 = arith.constant 0 : i32
    return %arg0, %c0_i32 : i32, i32
  }
  func.func @transform_3(%arg0: i32) -> (i32, i32) {
    %c0_i32 = arith.constant 0 : i32
    %c0_i32_0 = arith.constant 0 : i32
    return %c0_i32, %arg0 : i32, i32
  }
  func.func @transform_4(%arg0: i32) -> (i32, i32) {
    %c0_i32 = arith.constant 0 : i32
    %c0_i32_0 = arith.constant 0 : i32
    return %c0_i32, %arg0 : i32, i32
  }
}

</mosaic_0001>

<bundles_post_ra>
// kernel: tpu_custom_call.1
= control target key start
LH: loop header
LB: loop body
LE: loop exit
PB: predicated region body
PF: predicated region fallthrough
CT: control target
= control target key end

     0   :  { %10 = vsyncpa [#allocation3], 0  ;;  %s257_s21 = smov 126   ;;  %s349_s0 = inlined_call_operand.vmem [shape: f32[128,16], index: 0, kind: input, shape index: {}]   ;;  %s350_s1 = inlined_call_operand.vmem [shape: f32[4,128], index: 1, kind: input, shape index: {}]   ;;  %s351_s2 = inlined_call_operand.hbm [shape: f32[4,128], index: 2, kind: output, shape index: {0}]   ;;  %s352_s3 = inlined_call_operand.hbm [shape: f32[1,128], index: 3, kind: output, shape index: {1}]   ;;  %s353_s4 = inlined_call_operand.hbm [shape: s32[1,128], index: 4, kind: output, shape index: {2}]  }
   0x1   :  { %v16_v0 = vld [vmem:[%s349_s0] sm:$0xff]  ;;  %v17_v1 = vld [vmem:[%s349_s0 + $0x8] sm:$0xff] }
   0x2   :  { %32 = vxpose.xlu0.b32.start [1/16] (narrow) %v16_v0, 16  ;;  %v99_v2 = vld [vmem:[%s350_s1] sm:$0xf] }
   0x3   :  { %115 = vrot.lane.b32.xlu1 %v99_v2, %s257_s21 }
   0x6   :  { %33 = vxpose.xlu0.b32.cont [2/16] (narrow) %v17_v1, 16 }
   0x7   :  { %11 = vsyncpa [#allocation5], 0  ;;  %v18_v3 = vld [vmem:[%s349_s0 + $0x10] sm:$0xff]  ;;  %s258_s24 = smov 2   ;;  %v19_v4 = vld [vmem:[%s349_s0 + $0x18] sm:$0xff]  ;;  %v71_v17 = vlaneseq  ;;  %v259_v21 = vmov 0.5  }
   0x8   :  { %117 = vrot.lane.b32.xlu1 %v99_v2, %s258_s24  ;;  %v20_v5 = vld [vmem:[%s349_s0 + $0x20] sm:$0xff]  ;;  %v21_v6 = vld [vmem:[%s349_s0 + $0x28] sm:$0xff]  ;;  %v22_v7 = vld [vmem:[%s349_s0 + $0x30] sm:$0xff]  ;;  %v260_v28 = vmov 600.0   ;;  %s261_s24 = smov [#allocation2]  }
   0x9   :  { %v23_v8 = vld [vmem:[%s349_s0 + $0x38] sm:$0xff]  ;;  %v24_v9 = vld [vmem:[%s349_s0 + $0x40] sm:$0xff]  ;;  %v25_v10 = vld [vmem:[%s349_s0 + $0x48] sm:$0xff]  ;;  %v101_v18 = vand.u32 127, %v71_v17  ;;  %s146_s25 = sshll.u32 %s261_s24, 4  ;;  %s147_s25 = int_to_ptr.vmem [resolvable:$true] %s146_s25 }
   0xa   :  { %34 = vxpose.xlu0.b32.cont [3/16] (narrow) %v18_v3, 16  ;;  %v26_v11 = vld [vmem:[%s349_s0 + $0x50] sm:$0xff]  ;;  %v27_v12 = vld [vmem:[%s349_s0 + $0x58] sm:$0xff]  ;;  %v28_v13 = vld [vmem:[%s349_s0 + $0x60] sm:$0xff]  ;;  %p198_p1 = scmp.lt.s32.totalorder %s147_s25, %s147_s25 }
   0xb   :  { %v29_v14 = vld [vmem:[%s349_s0 + $0x68] sm:$0xff]  ;;  %v30_v15 = vld [vmem:[%s349_s0 + $0x70] sm:$0xff]  ;;  %v31_v16 = vld [vmem:[%s349_s0 + $0x78] sm:$0xff]  ;;  %v106_v19 = vand.u32 3, %v101_v18  ;;  %v126_v20 = vand.u32 1, %v101_v18  ;;  %s193_s0 = scalar_lea.vmem %s147_s25, 64 }
   0xc   :  { %p194_p0 = scmp.ne.s32.totalorder %s147_s25, %s193_s0  ;;  %p199_p2 = scmp.lt.s32.totalorder %s193_s0, %s193_s0 }
   0xd   :  { %vm114_vm0 = vcmp.lt.s32.totalorder %v106_v19, 2  ;;  %vm134_vm1 = vcmp.eq.s32.totalorder %v126_v20, 0 }
   0xe   :  { %35 = vxpose.xlu0.b32.cont [4/16] (narrow) %v19_v4, 16  ;;  %v121_v22 = vsel %vm114_vm0, -0.5, %v259_v21  ;;  %v135_v29 = vsel %vm134_vm1, 800.0, %v260_v28  ;;  %p200_p3 = por %p199_p2, %p198_p1 }
  0x10   :  { %p201_p4 = pnand %p200_p3, %p194_p0 }
  0x12   :  { %36 = vxpose.xlu0.b32.cont [5/16] (narrow) %v20_v5, 16 }
  0x16   :  { %37 = vxpose.xlu0.b32.cont [6/16] (narrow) %v21_v6, 16 }
  0x1a   :  { %38 = vxpose.xlu0.b32.cont [7/16] (narrow) %v22_v7, 16 }
  0x1e   :  { %39 = vxpose.xlu0.b32.cont [8/16] (narrow) %v23_v8, 16 }
  0x22   :  { %40 = vxpose.xlu0.b32.cont [9/16] (narrow) %v24_v9, 16 }
  0x26   :  { %41 = vxpose.xlu0.b32.cont [10/16] (narrow) %v25_v10, 16 }
  0x2a   :  { %42 = vxpose.xlu0.b32.cont [11/16] (narrow) %v26_v11, 16 }
  0x2e   :  { %43 = vxpose.xlu0.b32.cont [12/16] (narrow) %v27_v12, 16 }
  0x32   :  { %44 = vxpose.xlu0.b32.cont [13/16] (narrow) %v28_v13, 16 }
  0x36   :  { %45 = vxpose.xlu0.b32.cont [14/16] (narrow) %v29_v14, 16 }
  0x3a   :  { %46 = vxpose.xlu0.b32.cont [15/16] (narrow) %v30_v15, 16 }
  0x3e   :  { %47 = vxpose.xlu0.b32.end [16/16] (narrow) %v31_v16, 16 }
  0x75   :  { %v116_v23 = vpop.permute.xlu1 %115 }
  0x76   :  { %v120_v24 = vsel %vm114_vm0, %v116_v23, %v99_v2 }
  0x77   :  { %v136_v25 = vmul.f32 %v121_v22, %v120_v24 }
  0x7a   :  { %v118_v26 = vpop.permute.xlu1 %117 }
  0x7b   :  { %v119_v27 = vsel %vm114_vm0, %v99_v2, %v118_v26 }
  0x7c   :  { %v137_v31 = vadd.f32 %v136_v25, %v119_v27 }
  0x7e   :  { %v48_v30 = vpop.trf.xlu0  ;;  %v138_v32 = vmul.f32 %v137_v31, %v135_v29 }
  0x80   :  { %139 = vst [vmem:[#allocation2] sm:$0xf] %v138_v32 }
  0x82   :  { %v49_v33 = vpop.trf.xlu0 }
  0x83   :  { %v64_v34 = vmax.f32 %v48_v30, %v49_v33 }
  0x84   :  { %204 = shalt.err (!%p201_p4)
}
  0x85   :  { %149 = dma.vmem_to_hbm [thread:$0]  %s147_s25, 64, %s351_s2, [#allocation3]   ;;  %v65_v35 = vrot.slane %v64_v34, 4  ;;  %v72_v38 = vshrl.u32 %v71_v17, 7 }
  0x86   :  { %s262_s2 = smov [#allocation4]   ;;  %s263_s1 = smov [#allocation6]  }
  0x87   :  { %v66_v36 = vmax.f32 %v64_v34, %v65_v35  ;;  %v73_v41 = vadd.s32 8, %v72_v38  ;;  %s156_s28 = sshll.u32 %s262_s2, 4  ;;  %s166_s29 = sshll.u32 %s263_s1, 4  ;;  %s157_s28 = int_to_ptr.vmem [resolvable:$true] %s156_s28  ;;  %s167_s29 = int_to_ptr.vmem [resolvable:$true] %s166_s29 }
  0x88   :  { %s213_s30 = scalar_lea.vmem %s157_s28, 16  ;;  %s217_s5 = scalar_lea.vmem %s157_s28, 32 }
  0x89   :  { %v67_v37 = vrot.slane %v66_v36, 2  ;;  %p214_p5 = scmp.ne.s32.totalorder %s157_s28, %s213_s30  ;;  %p218_p6 = scmp.lt.s32.totalorder %s157_s28, %s157_s28 }
  0x8a   :  { %p219_p7 = scmp.lt.s32.totalorder %s217_s5, %s213_s30 }
  0x8b   :  { %v68_v39 = vmax.f32 %v66_v36, %v67_v37 }
  0x8c   :  { %p220_p8 = por %p219_p7, %p218_p6 }
  0x8d   :  { %v69_v40 = vrot.slane %v68_v39, 1 }
  0x8e   :  { %p221_p9 = pnand %p220_p8, %p214_p5 }
  0x8f   :  { %v70_v42 = vmax.f32 %v68_v39, %v69_v40 }
  0x91   :  { %vm74_vm2 = vcmp.eq.f32.partialorder %v48_v30, %v70_v42  ;;  %vm75_vm3 = vcmp.eq.f32.partialorder %v49_v33, %v70_v42  ;;  %v181_v43 = vmul.f32 -1.442695, %v70_v42 }
  0x92   :  { %v76_v44 = vsel %vm74_vm2, %v72_v38, 16  ;;  %v77_v45 = vsel %vm75_vm3, %v73_v41, 16 }
  0x93   :  { %vm78_vm4 = vcmp.lt.s32.totalorder %v76_v44, %v77_v45  ;;  %189 = vpow2.f32 %v181_v43 }
  0x94   :  { %v79_v46 = vsel %vm78_vm4, %v76_v44, %v77_v45 }
  0x95   :  { %v80_v47 = vrot.slane %v79_v46, 4 }
  0x97   :  { %vm81_vm5 = vcmp.lt.s32.totalorder %v79_v46, %v80_v47 }
  0x98   :  { %v82_v48 = vsel %vm81_vm5, %v79_v46, %v80_v47 }
  0x99   :  { %v83_v49 = vrot.slane %v82_v48, 2 }
  0x9b   :  { %vm84_vm6 = vcmp.lt.s32.totalorder %v82_v48, %v83_v49 }
  0x9c   :  { %v85_v50 = vsel %vm84_vm6, %v82_v48, %v83_v49 }
  0x9d   :  { %v86_v51 = vrot.slane %v85_v50, 1 }
  0x9f   :  { %vm87_vm7 = vcmp.lt.s32.totalorder %v85_v50, %v86_v51 }
  0xa0   :  { %v190_v52 = vpop.eup %189  ;;  %v88_v53 = vsel %vm87_vm7, %v85_v50, %v86_v51 }
  0xa1   :  { %v95_v54 = vadd.f32 1.0, %v190_v52  ;;  %vm89_vm8 = vcmp.lt.s32.totalorder %v88_v53, 15 }
  0xa2   :  { %v90_v55 = vsel %vm89_vm8, %v88_v53, 15 }
  0xa3   :  { %191 = vrcp.f32 %v95_v54  ;;  %91 = vst [vmem:[#allocation6] sm:$0x1] %v90_v55 }
  0xb0   :  { %v192_v56 = vpop.eup %191 }
  0xb1   :  { %98 = vst [vmem:[#allocation4] sm:$0x1] %v192_v56 }
  0xb2   :  { %224 = shalt.err (!%p221_p9)
}
  0xb3   :  { %159 = dma.vmem_to_hbm [thread:$0]  %s157_s28, 16, %s352_s3, [#allocation5]  }
  0xb4   :  { %s233_s8 = scalar_lea.vmem %s167_s29, 16  ;;  %s237_s9 = scalar_lea.vmem %s167_s29, 32 }
  0xb5   :  { %p234_p10 = scmp.ne.s32.totalorder %s167_s29, %s233_s8  ;;  %p238_p11 = scmp.lt.s32.totalorder %s167_s29, %s167_s29 }
  0xb6   :  { %p239_p12 = scmp.lt.s32.totalorder %s237_s9, %s233_s8 }
  0xb8   :  { %p240_p13 = por %p239_p12, %p238_p11 }
  0xba   :  { %p241_p0 = pnand %p240_p13, %p234_p10 }
  0xbc   :  { %244 = shalt.err (!%p241_p0)
}
  0xbd   :  { %169 = dma.vmem_to_hbm [thread:$0]  %s167_s29, 16, %s353_s4, [#allocation5]  }
  0xbe   :  { %253 = dma.done.wait [#allocation3], 64  }
  0xbf   :  { %254 = vsyncadd [#allocation3], 4294967232 }
  0xc0   :  { %255 = dma.done.wait [#allocation5], 32  }
  0xc1   :  { %256 = vsyncadd [#allocation5], 4294967264 }
  0xc2   :  { %179 = vsyncpa [#allocation3], 1 }
  0xc3   :  { %180 = vsyncpa [#allocation5], 1 }

</bundles_post_ra>
